<compile_context>
chip_gen: v6e
topology: v6e:2x2x1
jax: 0.10.0
libtpu: 0.0.40
codegen_flags: <defaults>
</compile_context>

<pallas_src>
import functools

import jax
import jax.numpy as jnp
from jax.experimental import pallas as pl
from jax.experimental.pallas import tpu as pltpu


LANE = 128


def _round_up(n, m):
    return ((n + m - 1) // m) * m


def _cdiv(a, b):
    return -(-a // b)


def _bf16_vpu():
    """bf16 epilogue on v6e/v7x (bf16 VALUs); f32 epilogue on v5e and older."""
    try:
        kind = jax.devices()[0].device_kind.lower()
    except Exception:
        return False
    return ("v6" in kind) or ("v7" in kind) or ("7x" in kind)


def _vmem_limit_bytes(budget_bytes):
    """Resident budget + headroom, clamped to ~90% of physical VMEM."""
    budget = int(budget_bytes) + (4 << 20)          # compiler-scratch headroom
    try:
        cap = int(pltpu.get_tpu_info().vmem_capacity_bytes)
    except Exception:
        cap = 64 << 20                              # v7x per-TC (smallest gen)
    return int(min(max(budget, 32 << 20), int(cap * 0.9)))


def _choose_batch_tile(B, max_tile_b):
    """Adaptive batch tile: bounded remainder waste, >=2 grid steps when B>=16
    so dimension_semantics=("parallel",) can shard across v7x's 2 TensorCores."""
    n_tiles = max(1, _cdiv(B, max_tile_b))
    if B >= 16 and n_tiles < 2:
        n_tiles = 2
    tile_b = _round_up(_cdiv(B, n_tiles), 8)
    n_tiles = _cdiv(B, tile_b)
    return tile_b, tile_b * n_tiles


def _const_spec(shape, single_buffer):
    """Batch-invariant (VMEM-resident) operand spec; single-buffered if supported."""
    idx = lambda i: (0, 0)
    if single_buffer:
        return pl.BlockSpec(shape, idx, pipeline_mode=pl.Buffered(1))
    return pl.BlockSpec(shape, idx)


def _mlp_kernel(x_ref, *refs, n_layers, bf16_epilogue):
    """Fused MLP: chain all Linear(+ReLU) layers over one batch tile.

    refs = (w0, b0, w1, b1, ..., w_{L-1}, b_{L-1}, o_ref)
      w_i : bf16 [K_pad, N_pad]   (zero-padded, VMEM-resident)
      b_i : f32  [1, N_pad]       (zero-padded)
      o   : f32  [tile_b, out_pad]
    """
    o_ref = refs[-1]
    wbs = refs[:-1]

    h = x_ref[...]                                   # bf16 [tile_b, ctx_k]
    for i in range(n_layers):
        w = wbs[2 * i][...]                          # bf16 [K, N]
        b = wbs[2 * i + 1][...]                      # f32  [1, N]
        y = jnp.dot(h, w, preferred_element_type=jnp.float32)
        if i < n_layers - 1:
            # ReLU (dropout = identity). bf16 epilogue on chips with bf16 VPU.
            if bf16_epilogue:
                h = jnp.maximum(y.astype(jnp.bfloat16) + b.astype(jnp.bfloat16), 0)
            else:
                h = jnp.maximum(y + b, 0.0).astype(jnp.bfloat16)
        else:
            o_ref[...] = (y + b).astype(o_ref.dtype)  # final linear, no activation


def init_base_nn_params(key, context_dim, hidden_dim, out_dim, depth):
    """Params mimicking PyTorch's default nn.Linear init
    (uniform(-1/sqrt(fan_in), 1/sqrt(fan_in))). Unpadded, f32, (fan_in, fan_out)."""
    dims = [context_dim] + [hidden_dim] * depth + [out_dim]
    params = []
    for i in range(len(dims) - 1):
        fan_in, fan_out = dims[i], dims[i + 1]
        key, kw, kb = jax.random.split(key, 3)
        bound = 1.0 / jnp.sqrt(jnp.float32(fan_in))
        w = jax.random.uniform(kw, (fan_in, fan_out), jnp.float32,
                               minval=-bound, maxval=bound)
        b = jax.random.uniform(kb, (fan_out,), jnp.float32,
                               minval=-bound, maxval=bound)
        params.append((w, b))
    return params


def pad_params(params, lane_align=LANE):
    """Zero-pad layers: first layer's K to a bf16-sublane multiple (16),
    everything else (all N dims, later K dims) to 128 lanes.
    Weights -> bf16, biases -> f32 (1, N_pad)."""
    padded = []
    for idx, (w, b) in enumerate(params):
        fi, fo = w.shape
        fip = _round_up(fi, 16) if idx == 0 else _round_up(fi, lane_align)
        fop = _round_up(fo, lane_align)
        wp = jnp.zeros((fip, fop), jnp.bfloat16).at[:fi, :fo].set(
            w.astype(jnp.bfloat16))
        bp = jnp.zeros((1, fop), jnp.float32).at[0, :fo].set(b)
        padded.append((wp, bp))
    return padded


def base_nn_forward(padded_params, x, out_dim, *, max_tile_b=512):
    """Forward pass of BaseNN: one fused pallas_call over batch tiles.

    padded_params: list of (W_pad bf16 [K_pad, N_pad], b_pad f32 [1, N_pad])
    x: [B, context_dim] (or [context_dim]) f32
    """
    # make_batch: ensure x is 2-D [B, context_dim]
    if x.ndim == 1:
        x = x[None, :]
    B, ctx = x.shape
    ctx_k = padded_params[0][0].shape[0]
    out_pad = padded_params[-1][0].shape[1]
    n_layers = len(padded_params)

    tile_b, b_pad = _choose_batch_tile(B, max_tile_b)

    # Input in bf16 (halves input DMA); pad only when actually needed.
    xb = x.astype(jnp.bfloat16)
    if (b_pad != B) or (ctx_k != ctx):
        x_in = jnp.zeros((b_pad, ctx_k), jnp.bfloat16).at[:B, :ctx].set(xb)
    else:
        x_in = xb

    flat_wb = []
    param_bytes = 0
    flops = 0
    for w, b in padded_params:
        flat_wb += [w, b]
        param_bytes += w.size * w.dtype.itemsize + b.size * b.dtype.itemsize
        flops += 2 * b_pad * w.shape[0] * w.shape[1]

    in_tile_bytes = tile_b * ctx_k * 2
    out_tile_bytes = tile_b * out_pad * 4
    max_feat = max(w.shape[1] for w, _ in padded_params)
    act_bytes = 3 * tile_b * max_feat * 4            # unrolled-layer temporaries
    vmem_limit = _vmem_limit_bytes(
        param_bytes + 2 * (in_tile_bytes + out_tile_bytes) + act_bytes)

    in_bytes = x_in.size * x_in.dtype.itemsize
    out_bytes = b_pad * out_pad * 4
    cost = pl.CostEstimate(flops=int(flops), transcendentals=0,
                           bytes_accessed=int(in_bytes + param_bytes + out_bytes))

    kernel = functools.partial(_mlp_kernel, n_layers=n_layers,
                               bf16_epilogue=_bf16_vpu())

    def _call(single_buffer_params):
        in_specs = [pl.BlockSpec((tile_b, ctx_k), lambda i: (i, 0))]
        for w, b in padded_params:
            in_specs.append(_const_spec(w.shape, single_buffer_params))
            in_specs.append(_const_spec(b.shape, single_buffer_params))
        return pl.pallas_call(
            kernel,
            out_shape=jax.ShapeDtypeStruct((b_pad, out_pad), jnp.float32),
            grid=(b_pad // tile_b,),
            in_specs=in_specs,
            out_specs=pl.BlockSpec((tile_b, out_pad), lambda i: (i, 0)),
            compiler_params=pltpu.CompilerParams(
                dimension_semantics=("parallel",),   # batch axis -> 2 TCs on v7x
                vmem_limit_bytes=vmem_limit),
            cost_estimate=cost,
        )(x_in, *flat_wb)

    try:
        out = _call(True)        # weights/biases single-buffered (VMEM-resident)
    except Exception:
        out = _call(False)       # fallback: default double-buffering

    return out[:B, :out_dim]


if __name__ == "__main__":
    # Small shapes consistent with the module.
    context_dim, hidden_dim, out_dim, depth = 16, 32, 4, 3
    batch = 8

    key = jax.random.PRNGKey(0)
    kparams, kx = jax.random.split(key)
    params = init_base_nn_params(kparams, context_dim, hidden_dim, out_dim, depth)
    padded = pad_params(params)
    x = jax.random.normal(kx, (batch, context_dim), jnp.float32)

    out = base_nn_forward(padded, x, out_dim)
    jax.block_until_ready(out)

    # Pure-JAX reference matching the kernel arithmetic
    # (bf16 matmuls, f32 acc, generation-dependent epilogue dtype).
    bf16_ep = _bf16_vpu()
    n_layers = len(params)
    h = x.astype(jnp.bfloat16)
    ref = None
    for i, (w, b) in enumerate(params):
        y = jnp.dot(h, w.astype(jnp.bfloat16), preferred_element_type=jnp.float32)
        if i < n_layers - 1:
            if bf16_ep:
                h = jnp.maximum(y.astype(jnp.bfloat16) + b.astype(jnp.bfloat16), 0)
            else:
                h = jnp.maximum(y + b, 0.0).astype(jnp.bfloat16)
        else:
            ref = y + b

    assert out.shape == (batch, out_dim)
    max_err = jnp.max(jnp.abs(out - ref))
    assert jnp.allclose(out, ref, atol=1e-2, rtol=1e-2), f"max abs err {max_err}"

    print("KERNEL_OK")
</pallas_src>

<mosaic_0001>
module attributes {stable_mosaic.version = 11 : i64} {
  func.func @_mlp_kernel(%arg0: i32, %arg1: memref<8x16xbf16, #tpu.memory_space<vmem>>, %arg2: memref<16x128xbf16, #tpu.memory_space<vmem>>, %arg3: memref<1x128xf32, #tpu.memory_space<vmem>>, %arg4: memref<128x128xbf16, #tpu.memory_space<vmem>>, %arg5: memref<1x128xf32, #tpu.memory_space<vmem>>, %arg6: memref<128x128xbf16, #tpu.memory_space<vmem>>, %arg7: memref<1x128xf32, #tpu.memory_space<vmem>>, %arg8: memref<128x128xbf16, #tpu.memory_space<vmem>>, %arg9: memref<1x128xf32, #tpu.memory_space<vmem>>, %arg10: memref<8x128xf32, #tpu.memory_space<vmem>>) attributes {dimension_semantics = [#tpu.dimension_semantics<parallel>], iteration_bounds = array<i64: 1>, scalar_prefetch = 0 : i64, scratch_operands = 0 : i64, tpu.core_type = #tpu.core_type<tc>, window_params = [{transform_indices = @transform_0, window_bounds = array<i64: 8, 16>}, {pipeline_mode = #tpu.pipeline_mode<synchronous>, transform_indices = @transform_1, window_bounds = array<i64: 16, 128>}, {pipeline_mode = #tpu.pipeline_mode<synchronous>, transform_indices = @transform_2, window_bounds = array<i64: 1, 128>}, {pipeline_mode = #tpu.pipeline_mode<synchronous>, transform_indices = @transform_3, window_bounds = array<i64: 128, 128>}, {pipeline_mode = #tpu.pipeline_mode<synchronous>, transform_indices = @transform_4, window_bounds = array<i64: 1, 128>}, {pipeline_mode = #tpu.pipeline_mode<synchronous>, transform_indices = @transform_5, window_bounds = array<i64: 128, 128>}, {pipeline_mode = #tpu.pipeline_mode<synchronous>, transform_indices = @transform_6, window_bounds = array<i64: 1, 128>}, {pipeline_mode = #tpu.pipeline_mode<synchronous>, transform_indices = @transform_7, window_bounds = array<i64: 128, 128>}, {pipeline_mode = #tpu.pipeline_mode<synchronous>, transform_indices = @transform_8, window_bounds = array<i64: 1, 128>}, {transform_indices = @transform_9, window_bounds = array<i64: 8, 128>}]} {
    %c0 = arith.constant 0 : index
    %c0_0 = arith.constant 0 : index
    %0 = vector.load %arg1[%c0, %c0_0] : memref<8x16xbf16, #tpu.memory_space<vmem>>, vector<8x16xbf16>
    %c0_1 = arith.constant 0 : index
    %c0_2 = arith.constant 0 : index
    %1 = vector.load %arg2[%c0_1, %c0_2] : memref<16x128xbf16, #tpu.memory_space<vmem>>, vector<16x128xbf16>
    %c0_3 = arith.constant 0 : index
    %c0_4 = arith.constant 0 : index
    %2 = vector.load %arg3[%c0_3, %c0_4] : memref<1x128xf32, #tpu.memory_space<vmem>>, vector<1x128xf32>
    %cst = arith.constant dense<0.000000e+00> : vector<8x128xf32>
    %3 = tpu.matmul %0, %1, %cst {dimension_numbers = #tpu.dot_dimension_numbers<[1], [0], [0], [1], [0, 0, 1, 1], [], []>} : vector<8x16xbf16>, vector<16x128xbf16>, vector<8x128xf32> -> vector<8x128xf32>
    %4 = vector.broadcast %2 : vector<1x128xf32> to vector<8x128xf32>
    %5 = arith.addf %3, %4 : vector<8x128xf32>
    %cst_5 = arith.constant 0.000000e+00 : f32
    %6 = vector.broadcast %cst_5 : f32 to vector<8x128xf32>
    %7 = arith.maximumf %5, %6 : vector<8x128xf32>
    %8 = arith.truncf %7 : vector<8x128xf32> to vector<8x128xbf16>
    %c0_6 = arith.constant 0 : index
    %c0_7 = arith.constant 0 : index
    %9 = vector.load %arg4[%c0_6, %c0_7] : memref<128x128xbf16, #tpu.memory_space<vmem>>, vector<128x128xbf16>
    %c0_8 = arith.constant 0 : index
    %c0_9 = arith.constant 0 : index
    %10 = vector.load %arg5[%c0_8, %c0_9] : memref<1x128xf32, #tpu.memory_space<vmem>>, vector<1x128xf32>
    %cst_10 = arith.constant dense<0.000000e+00> : vector<8x128xf32>
    %11 = tpu.matmul %8, %9, %cst_10 {dimension_numbers = #tpu.dot_dimension_numbers<[1], [0], [0], [1], [0, 0, 1, 1], [], []>} : vector<8x128xbf16>, vector<128x128xbf16>, vector<8x128xf32> -> vector<8x128xf32>
    %12 = vector.broadcast %10 : vector<1x128xf32> to vector<8x128xf32>
    %13 = arith.addf %11, %12 : vector<8x128xf32>
    %cst_11 = arith.constant 0.000000e+00 : f32
    %14 = vector.broadcast %cst_11 : f32 to vector<8x128xf32>
    %15 = arith.maximumf %13, %14 : vector<8x128xf32>
    %16 = arith.truncf %15 : vector<8x128xf32> to vector<8x128xbf16>
    %c0_12 = arith.constant 0 : index
    %c0_13 = arith.constant 0 : index
    %17 = vector.load %arg6[%c0_12, %c0_13] : memref<128x128xbf16, #tpu.memory_space<vmem>>, vector<128x128xbf16>
    %c0_14 = arith.constant 0 : index
    %c0_15 = arith.constant 0 : index
    %18 = vector.load %arg7[%c0_14, %c0_15] : memref<1x128xf32, #tpu.memory_space<vmem>>, vector<1x128xf32>
    %cst_16 = arith.constant dense<0.000000e+00> : vector<8x128xf32>
    %19 = tpu.matmul %16, %17, %cst_16 {dimension_numbers = #tpu.dot_dimension_numbers<[1], [0], [0], [1], [0, 0, 1, 1], [], []>} : vector<8x128xbf16>, vector<128x128xbf16>, vector<8x128xf32> -> vector<8x128xf32>
    %20 = vector.broadcast %18 : vector<1x128xf32> to vector<8x128xf32>
    %21 = arith.addf %19, %20 : vector<8x128xf32>
    %cst_17 = arith.constant 0.000000e+00 : f32
    %22 = vector.broadcast %cst_17 : f32 to vector<8x128xf32>
    %23 = arith.maximumf %21, %22 : vector<8x128xf32>
    %24 = arith.truncf %23 : vector<8x128xf32> to vector<8x128xbf16>
    %c0_18 = arith.constant 0 : index
    %c0_19 = arith.constant 0 : index
    %25 = vector.load %arg8[%c0_18, %c0_19] : memref<128x128xbf16, #tpu.memory_space<vmem>>, vector<128x128xbf16>
    %c0_20 = arith.constant 0 : index
    %c0_21 = arith.constant 0 : index
    %26 = vector.load %arg9[%c0_20, %c0_21] : memref<1x128xf32, #tpu.memory_space<vmem>>, vector<1x128xf32>
    %cst_22 = arith.constant dense<0.000000e+00> : vector<8x128xf32>
    %27 = tpu.matmul %24, %25, %cst_22 {dimension_numbers = #tpu.dot_dimension_numbers<[1], [0], [0], [1], [0, 0, 1, 1], [], []>} : vector<8x128xbf16>, vector<128x128xbf16>, vector<8x128xf32> -> vector<8x128xf32>
    %28 = vector.broadcast %26 : vector<1x128xf32> to vector<8x128xf32>
    %29 = arith.addf %27, %28 : vector<8x128xf32>
    %c0_23 = arith.constant 0 : index
    %c0_24 = arith.constant 0 : index
    %30 = vector.load %arg10[%c0_23, %c0_24] : memref<8x128xf32, #tpu.memory_space<vmem>>, vector<8x128xf32>
    tpu.vector_store %arg10[%c0_23, %c0_24], %29 {strides = array<i32>} : memref<8x128xf32, #tpu.memory_space<vmem>>, vector<8x128xf32>,
    return
  }
  func.func @transform_0(%arg0: i32) -> (i32, i32) {
    %c0_i32 = arith.constant 0 : i32
    %c0_i32_0 = arith.constant 0 : i32
    return %arg0, %c0_i32 : i32, i32
  }
  func.func @transform_1(%arg0: i32) -> (i32, i32) {
    %c0_i32 = arith.constant 0 : i32
    %c0_i32_0 = arith.constant 0 : i32
    %c0_i32_1 = arith.constant 0 : i32
    return %c0_i32, %c0_i32_0 : i32, i32
  }
  func.func @transform_2(%arg0: i32) -> (i32, i32) {
    %c0_i32 = arith.constant 0 : i32
    %c0_i32_0 = arith.constant 0 : i32
    %c0_i32_1 = arith.constant 0 : i32
    return %c0_i32, %c0_i32_0 : i32, i32
  }
  func.func @transform_3(%arg0: i32) -> (i32, i32) {
    %c0_i32 = arith.constant 0 : i32
    %c0_i32_0 = arith.constant 0 : i32
    %c0_i32_1 = arith.constant 0 : i32
    return %c0_i32, %c0_i32_0 : i32, i32
  }
  func.func @transform_4(%arg0: i32) -> (i32, i32) {
    %c0_i32 = arith.constant 0 : i32
    %c0_i32_0 = arith.constant 0 : i32
    %c0_i32_1 = arith.constant 0 : i32
    return %c0_i32, %c0_i32_0 : i32, i32
  }
  func.func @transform_5(%arg0: i32) -> (i32, i32) {
    %c0_i32 = arith.constant 0 : i32
    %c0_i32_0 = arith.constant 0 : i32
    %c0_i32_1 = arith.constant 0 : i32
    return %c0_i32, %c0_i32_0 : i32, i32
  }
  func.func @transform_6(%arg0: i32) -> (i32, i32) {
    %c0_i32 = arith.constant 0 : i32
    %c0_i32_0 = arith.constant 0 : i32
    %c0_i32_1 = arith.constant 0 : i32
    return %c0_i32, %c0_i32_0 : i32, i32
  }
  func.func @transform_7(%arg0: i32) -> (i32, i32) {
    %c0_i32 = arith.constant 0 : i32
    %c0_i32_0 = arith.constant 0 : i32
    %c0_i32_1 = arith.constant 0 : i32
    return %c0_i32, %c0_i32_0 : i32, i32
  }
  func.func @transform_8(%arg0: i32) -> (i32, i32) {
    %c0_i32 = arith.constant 0 : i32
    %c0_i32_0 = arith.constant 0 : i32
    %c0_i32_1 = arith.constant 0 : i32
    return %c0_i32, %c0_i32_0 : i32, i32
  }
  func.func @transform_9(%arg0: i32) -> (i32, i32) {
    %c0_i32 = arith.constant 0 : i32
    %c0_i32_0 = arith.constant 0 : i32
    return %arg0, %c0_i32 : i32, i32
  }
}

module attributes {stable_mosaic.version = 11 : i64} {
  func.func @_mlp_kernel(%arg0: i32, %arg1: memref<8x16xbf16, #tpu.memory_space<vmem>>, %arg2: memref<16x128xbf16, #tpu.memory_space<vmem>>, %arg3: memref<1x128xf32, #tpu.memory_space<vmem>>, %arg4: memref<128x128xbf16, #tpu.memory_space<vmem>>, %arg5: memref<1x128xf32, #tpu.memory_space<vmem>>, %arg6: memref<128x128xbf16, #tpu.memory_space<vmem>>, %arg7: memref<1x128xf32, #tpu.memory_space<vmem>>, %arg8: memref<128x128xbf16, #tpu.memory_space<vmem>>, %arg9: memref<1x128xf32, #tpu.memory_space<vmem>>, %arg10: memref<8x128xf32, #tpu.memory_space<vmem>>) attributes {dimension_semantics = [#tpu.dimension_semantics<parallel>], iteration_bounds = array<i64: 1>, scalar_prefetch = 0 : i64, scratch_operands = 0 : i64, tpu.core_type = #tpu.core_type<tc>, window_params = [{transform_indices = @transform_0, window_bounds = array<i64: 8, 16>}, {pipeline_mode = #tpu.pipeline_mode<synchronous>, transform_indices = @transform_1, window_bounds = array<i64: 16, 128>}, {pipeline_mode = #tpu.pipeline_mode<synchronous>, transform_indices = @transform_2, window_bounds = array<i64: 1, 128>}, {pipeline_mode = #tpu.pipeline_mode<synchronous>, transform_indices = @transform_3, window_bounds = array<i64: 128, 128>}, {pipeline_mode = #tpu.pipeline_mode<synchronous>, transform_indices = @transform_4, window_bounds = array<i64: 1, 128>}, {pipeline_mode = #tpu.pipeline_mode<synchronous>, transform_indices = @transform_5, window_bounds = array<i64: 128, 128>}, {pipeline_mode = #tpu.pipeline_mode<synchronous>, transform_indices = @transform_6, window_bounds = array<i64: 1, 128>}, {pipeline_mode = #tpu.pipeline_mode<synchronous>, transform_indices = @transform_7, window_bounds = array<i64: 128, 128>}, {pipeline_mode = #tpu.pipeline_mode<synchronous>, transform_indices = @transform_8, window_bounds = array<i64: 1, 128>}, {transform_indices = @transform_9, window_bounds = array<i64: 8, 128>}]} {
    %c0 = arith.constant 0 : index
    %c0_0 = arith.constant 0 : index
    %0 = vector.load %arg1[%c0, %c0_0] : memref<8x16xbf16, #tpu.memory_space<vmem>>, vector<8x16xbf16>
    %c0_1 = arith.constant 0 : index
    %c0_2 = arith.constant 0 : index
    %1 = vector.load %arg2[%c0_1, %c0_2] : memref<16x128xbf16, #tpu.memory_space<vmem>>, vector<16x128xbf16>
    %c0_3 = arith.constant 0 : index
    %c0_4 = arith.constant 0 : index
    %2 = vector.load %arg3[%c0_3, %c0_4] : memref<1x128xf32, #tpu.memory_space<vmem>>, vector<1x128xf32>
    %cst = arith.constant dense<0.000000e+00> : vector<8x128xf32>
    %3 = tpu.matmul %0, %1, %cst {dimension_numbers = #tpu.dot_dimension_numbers<[1], [0], [0], [1], [0, 0, 1, 1], [], []>} : vector<8x16xbf16>, vector<16x128xbf16>, vector<8x128xf32> -> vector<8x128xf32>
    %4 = vector.broadcast %2 : vector<1x128xf32> to vector<8x128xf32>
    %5 = arith.addf %3, %4 : vector<8x128xf32>
    %cst_5 = arith.constant 0.000000e+00 : f32
    %6 = vector.broadcast %cst_5 : f32 to vector<8x128xf32>
    %7 = arith.maximumf %5, %6 : vector<8x128xf32>
    %8 = arith.truncf %7 : vector<8x128xf32> to vector<8x128xbf16>
    %c0_6 = arith.constant 0 : index
    %c0_7 = arith.constant 0 : index
    %9 = vector.load %arg4[%c0_6, %c0_7] : memref<128x128xbf16, #tpu.memory_space<vmem>>, vector<128x128xbf16>
    %c0_8 = arith.constant 0 : index
    %c0_9 = arith.constant 0 : index
    %10 = vector.load %arg5[%c0_8, %c0_9] : memref<1x128xf32, #tpu.memory_space<vmem>>, vector<1x128xf32>
    %cst_10 = arith.constant dense<0.000000e+00> : vector<8x128xf32>
    %11 = tpu.matmul %8, %9, %cst_10 {dimension_numbers = #tpu.dot_dimension_numbers<[1], [0], [0], [1], [0, 0, 1, 1], [], []>} : vector<8x128xbf16>, vector<128x128xbf16>, vector<8x128xf32> -> vector<8x128xf32>
    %12 = vector.broadcast %10 : vector<1x128xf32> to vector<8x128xf32>
    %13 = arith.addf %11, %12 : vector<8x128xf32>
    %cst_11 = arith.constant 0.000000e+00 : f32
    %14 = vector.broadcast %cst_11 : f32 to vector<8x128xf32>
    %15 = arith.maximumf %13, %14 : vector<8x128xf32>
    %16 = arith.truncf %15 : vector<8x128xf32> to vector<8x128xbf16>
    %c0_12 = arith.constant 0 : index
    %c0_13 = arith.constant 0 : index
    %17 = vector.load %arg6[%c0_12, %c0_13] : memref<128x128xbf16, #tpu.memory_space<vmem>>, vector<128x128xbf16>
    %c0_14 = arith.constant 0 : index
    %c0_15 = arith.constant 0 : index
    %18 = vector.load %arg7[%c0_14, %c0_15] : memref<1x128xf32, #tpu.memory_space<vmem>>, vector<1x128xf32>
    %cst_16 = arith.constant dense<0.000000e+00> : vector<8x128xf32>
    %19 = tpu.matmul %16, %17, %cst_16 {dimension_numbers = #tpu.dot_dimension_numbers<[1], [0], [0], [1], [0, 0, 1, 1], [], []>} : vector<8x128xbf16>, vector<128x128xbf16>, vector<8x128xf32> -> vector<8x128xf32>
    %20 = vector.broadcast %18 : vector<1x128xf32> to vector<8x128xf32>
    %21 = arith.addf %19, %20 : vector<8x128xf32>
    %cst_17 = arith.constant 0.000000e+00 : f32
    %22 = vector.broadcast %cst_17 : f32 to vector<8x128xf32>
    %23 = arith.maximumf %21, %22 : vector<8x128xf32>
    %24 = arith.truncf %23 : vector<8x128xf32> to vector<8x128xbf16>
    %c0_18 = arith.constant 0 : index
    %c0_19 = arith.constant 0 : index
    %25 = vector.load %arg8[%c0_18, %c0_19] : memref<128x128xbf16, #tpu.memory_space<vmem>>, vector<128x128xbf16>
    %c0_20 = arith.constant 0 : index
    %c0_21 = arith.constant 0 : index
    %26 = vector.load %arg9[%c0_20, %c0_21] : memref<1x128xf32, #tpu.memory_space<vmem>>, vector<1x128xf32>
    %cst_22 = arith.constant dense<0.000000e+00> : vector<8x128xf32>
    %27 = tpu.matmul %24, %25, %cst_22 {dimension_numbers = #tpu.dot_dimension_numbers<[1], [0], [0], [1], [0, 0, 1, 1], [], []>} : vector<8x128xbf16>, vector<128x128xbf16>, vector<8x128xf32> -> vector<8x128xf32>
    %28 = vector.broadcast %26 : vector<1x128xf32> to vector<8x128xf32>
    %29 = arith.addf %27, %28 : vector<8x128xf32>
    %c0_23 = arith.constant 0 : index
    %c0_24 = arith.constant 0 : index
    %30 = vector.load %arg10[%c0_23, %c0_24] : memref<8x128xf32, #tpu.memory_space<vmem>>, vector<8x128xf32>
    tpu.vector_store %arg10[%c0_23, %c0_24], %29 {strides = array<i32>} : memref<8x128xf32, #tpu.memory_space<vmem>>, vector<8x128xf32>,
    return
  }
  func.func @transform_0(%arg0: i32) -> (i32, i32) {
    %c0_i32 = arith.constant 0 : i32
    %c0_i32_0 = arith.constant 0 : i32
    return %arg0, %c0_i32 : i32, i32
  }
  func.func @transform_1(%arg0: i32) -> (i32, i32) {
    %c0_i32 = arith.constant 0 : i32
    %c0_i32_0 = arith.constant 0 : i32
    %c0_i32_1 = arith.constant 0 : i32
    return %c0_i32, %c0_i32_0 : i32, i32
  }
  func.func @transform_2(%arg0: i32) -> (i32, i32) {
    %c0_i32 = arith.constant 0 : i32
    %c0_i32_0 = arith.constant 0 : i32
    %c0_i32_1 = arith.constant 0 : i32
    return %c0_i32, %c0_i32_0 : i32, i32
  }
  func.func @transform_3(%arg0: i32) -> (i32, i32) {
    %c0_i32 = arith.constant 0 : i32
    %c0_i32_0 = arith.constant 0 : i32
    %c0_i32_1 = arith.constant 0 : i32
    return %c0_i32, %c0_i32_0 : i32, i32
  }
  func.func @transform_4(%arg0: i32) -> (i32, i32) {
    %c0_i32 = arith.constant 0 : i32
    %c0_i32_0 = arith.constant 0 : i32
    %c0_i32_1 = arith.constant 0 : i32
    return %c0_i32, %c0_i32_0 : i32, i32
  }
  func.func @transform_5(%arg0: i32) -> (i32, i32) {
    %c0_i32 = arith.constant 0 : i32
    %c0_i32_0 = arith.constant 0 : i32
    %c0_i32_1 = arith.constant 0 : i32
    return %c0_i32, %c0_i32_0 : i32, i32
  }
  func.func @transform_6(%arg0: i32) -> (i32, i32) {
    %c0_i32 = arith.constant 0 : i32
    %c0_i32_0 = arith.constant 0 : i32
    %c0_i32_1 = arith.constant 0 : i32
    return %c0_i32, %c0_i32_0 : i32, i32
  }
  func.func @transform_7(%arg0: i32) -> (i32, i32) {
    %c0_i32 = arith.constant 0 : i32
    %c0_i32_0 = arith.constant 0 : i32
    %c0_i32_1 = arith.constant 0 : i32
    return %c0_i32, %c0_i32_0 : i32, i32
  }
  func.func @transform_8(%arg0: i32) -> (i32, i32) {
    %c0_i32 = arith.constant 0 : i32
    %c0_i32_0 = arith.constant 0 : i32
    %c0_i32_1 = arith.constant 0 : i32
    return %c0_i32, %c0_i32_0 : i32, i32
  }
  func.func @transform_9(%arg0: i32) -> (i32, i32) {
    %c0_i32 = arith.constant 0 : i32
    %c0_i32_0 = arith.constant 0 : i32
    return %arg0, %c0_i32 : i32, i32
  }
}

</mosaic_0001>

<bundles_post_ra>
// kernel: tpu_custom_call.1
= control target key start
LH: loop header
LB: loop body
LE: loop exit
PB: predicated region body
PF: predicated region fallthrough
CT: control target
= control target key end

     0   :  { %14 = vsyncpa [#allocation3], 0  ;;  %s940_s0 = inlined_call_operand.hbm [shape: bf16[8,16], index: 0, kind: input, shape index: {}]   ;;  %s941_s1 = inlined_call_operand.hbm [shape: bf16[16,128], index: 1, kind: input, shape index: {}]   ;;  %s942_s2 = inlined_call_operand.vmem [shape: f32[1,128], index: 2, kind: input, shape index: {}]   ;;  %s943_s3 = inlined_call_operand.hbm [shape: bf16[128,128], index: 3, kind: input, shape index: {}]   ;;  %s944_s4 = inlined_call_operand.vmem [shape: f32[1,128], index: 4, kind: input, shape index: {}]   ;;  %s945_s5 = inlined_call_operand.hbm [shape: bf16[128,128], index: 5, kind: input, shape index: {}]   ;;  %s946_s6 = inlined_call_operand.vmem [shape: f32[1,128], index: 6, kind: input, shape index: {}]   ;;  %s947_s7 = inlined_call_operand.hbm [shape: bf16[128,128], index: 7, kind: input, shape index: {}]   ;;  %s948_s8 = inlined_call_operand.vmem [shape: f32[1,128], index: 8, kind: input, shape index: {}]   ;;  %s949_s9 = inlined_call_operand.hbm [shape: f32[8,128], index: 9, kind: output, shape index: {}]  }
   0x1   :  { %15 = vsyncpa [#allocation6], 0 }
   0x2   :  { %16 = vsyncpa [#allocation9], 0 }
   0x3   :  { %17 = vsyncpa [#allocation4], 0  ;;  %s805_s30 = smov [#allocation5]  }
   0x4   :  { %s33_s10 = sshll.u32 %s805_s30, 4  ;;  %s34_s10 = int_to_ptr.vmem [resolvable:$true] %s33_s10 }
   0x5   :  { %s685_s11 = scalar_lea.vmem %s34_s10, 128  ;;  %p690_p1 = scmp.lt.s32.totalorder %s34_s10, %s34_s10 }
   0x6   :  { %p686_p0 = scmp.ne.s32.totalorder %s34_s10, %s685_s11  ;;  %p691_p2 = scmp.lt.s32.totalorder %s685_s11, %s685_s11 }
   0x8   :  { %p692_p3 = por %p691_p2, %p690_p1 }
   0xa   :  { %p693_p4 = pnand %p692_p3, %p686_p0 }
   0xc   :  { %696 = shalt.err (!%p693_p4)
}
   0xd   :  { %s806_s12 = smov 64   ;;  %s807_s13 = smov 4  }
   0xe   :  { %39 = dma.hbm_to_vmem [thread:$0]  %s941_s1, 128, %s34_s10, [#allocation6], %s806_s12, %s806_s12, %s807_s13  }
   0xf   :  { %s808_s16 = smov [#allocation8]   ;;  %s809_s18 = smov [#allocation2]  }
  0x10   :  { %s61_s17 = sshll.u32 %s808_s16, 4  ;;  %s24_s19 = sshll.u32 %s809_s18, 4  ;;  %s62_s17 = int_to_ptr.vmem [resolvable:$true] %s61_s17  ;;  %s25_s19 = int_to_ptr.vmem [resolvable:$true] %s24_s19 }
  0x11   :  { %s705_s20 = scalar_lea.vmem %s62_s17, 1024  ;;  %p710_p6 = scmp.lt.s32.totalorder %s62_s17, %s62_s17 }
  0x12   :  { %p706_p5 = scmp.ne.s32.totalorder %s62_s17, %s705_s20  ;;  %p711_p7 = scmp.lt.s32.totalorder %s705_s20, %s705_s20 }
  0x14   :  { %p712_p8 = por %p711_p7, %p710_p6 }
  0x16   :  { %p713_p9 = pnand %p712_p8, %p706_p5 }
  0x18   :  { %716 = shalt.err (!%p713_p9)
}
  0x19   :  { %67 = dma.hbm_to_vmem [thread:$0]  %s945_s5, 1024, %s62_s17, [#allocation9], %s806_s12, %s806_s12, %s807_s13  }
  0x1a   :  { %s725_s1 = scalar_lea.vmem %s25_s19, 64  ;;  %p730_p11 = scmp.lt.s32.totalorder %s25_s19, %s25_s19 }
  0x1b   :  { %p726_p10 = scmp.ne.s32.totalorder %s25_s19, %s725_s1  ;;  %p731_p12 = scmp.lt.s32.totalorder %s725_s1, %s725_s1 }
  0x1d   :  { %p732_p13 = por %p731_p12, %p730_p11 }
  0x1f   :  { %p733_p0 = pnand %p732_p13, %p726_p10 }
  0x21   :  { %736 = shalt.err (!%p733_p0)
}
  0x22   :  { %27 = dma.hbm_to_vmem [thread:$0]  %s940_s0, 64, %s25_s19, [#allocation3]  }
  0x23   :  { %s810_s25 = smov [#allocation7]   ;;  %s811_s27 = smov [#allocation10]  }
  0x24   :  { %s47_s26 = sshll.u32 %s810_s25, 4  ;;  %s75_s28 = sshll.u32 %s811_s27, 4  ;;  %s48_s26 = int_to_ptr.vmem [resolvable:$true] %s47_s26  ;;  %s76_s28 = int_to_ptr.vmem [resolvable:$true] %s75_s28 }
  0x25   :  { %s745_s29 = scalar_lea.vmem %s48_s26, 1024  ;;  %p750_p2 = scmp.lt.s32.totalorder %s48_s26, %s48_s26 }
  0x26   :  { %p746_p1 = scmp.ne.s32.totalorder %s48_s26, %s745_s29  ;;  %p751_p3 = scmp.lt.s32.totalorder %s745_s29, %s745_s29 }
  0x28   :  { %p752_p4 = por %p751_p3, %p750_p2 }
  0x2a   :  { %p753_p5 = pnand %p752_p4, %p746_p1 }
  0x2c   :  { %756 = shalt.err (!%p753_p5)
}
  0x2d   :  { %53 = dma.hbm_to_vmem [thread:$0]  %s943_s3, 1024, %s48_s26, [#allocation6], %s806_s12, %s806_s12, %s807_s13  }
  0x2e   :  { %s765_s0 = scalar_lea.vmem %s76_s28, 1024  ;;  %p770_p7 = scmp.lt.s32.totalorder %s76_s28, %s76_s28 }
  0x2f   :  { %p766_p6 = scmp.ne.s32.totalorder %s76_s28, %s765_s0  ;;  %p771_p8 = scmp.lt.s32.totalorder %s765_s0, %s765_s0 }
  0x31   :  { %p772_p9 = por %p771_p8, %p770_p7 }
  0x33   :  { %p773_p10 = pnand %p772_p9, %p766_p6 }
  0x35   :  { %776 = shalt.err (!%p773_p10)
}
  0x36   :  { %81 = dma.hbm_to_vmem [thread:$0]  %s947_s7, 1024, %s76_s28, [#allocation9], %s806_s12, %s806_s12, %s807_s13  }
  0x37   :  { %797 = dma.done.wait [#allocation3], 64  }
  0x38   :  { %798 = vsyncadd [#allocation3], 4294967232 }
  0x39   :  { %799 = dma.done.wait [#allocation6], 1152  }
  0x3a   :  { %800 = vsyncadd [#allocation6], 4294966144 }
  0x3b   :  { %801 = dma.done.wait [#allocation9], 2048  }
  0x3c   :  { %802 = vsyncadd [#allocation9], 4294965248  ;;  %v812_v0 = vmov 0.0   ;;  %vm813_vm0 = vmmov 0   ;;  %v652_v1 = vld [vmem:[#allocation5] sm:$0xff]   ;;  %vm116_vm1 = vcmask 130048  }
  0x3d   :  { %576 = vmatprep.subr.bf16.mxu0 %v812_v0  ;;  %578 = vmatprep.mubr.msk.bf16.mxu0 %vm813_vm0, %v812_v0  ;;  %v100_v2 = vld [vmem:[#allocation2] sm:$0xf]  ;;  %v653_v3 = vld [vmem:[#allocation7 + $0x38] sm:$0xff]   ;;  %v655_v5 = vld [vmem:[#allocation7 + $0x28] sm:$0xff]   ;;  %s814_s16 = smov [#allocation11]  }
  0x3e   :  { %582 = vmatprep.subr.bf16.mxu1 %v812_v0  ;;  %598 = vmatprep.mubr.msk.bf16.mxu1 %vm813_vm0, %v812_v0  ;;  %v654_v4 = vld [vmem:[#allocation7 + $0x30] sm:$0xff]   ;;  %v656_v6 = vld [vmem:[#allocation7 + $0x20] sm:$0xff]   ;;  %v657_v7 = vld [vmem:[#allocation7 + $0x18] sm:$0xff]   ;;  %s506_s17 = sshll.u32 %s814_s16, 4  ;;  %s507_s17 = int_to_ptr.vmem [resolvable:$true] %s506_s17 }
  0x3f   :  { %577 = vmatpush3.bf16.msra.mxu0 %v652_v1  ;;  %583 = vmatpush3.bf16.msra.mxu1 %v653_v3  ;;  %v658_v8 = vld [vmem:[#allocation7 + $0x10] sm:$0xff]   ;;  %v659_v9 = vld [vmem:[#allocation7 + $0x8] sm:$0xff]   ;;  %v660_v10 = vld [vmem:[#allocation7] sm:$0xff]   ;;  %p782_p12 = scmp.lt.s32.totalorder %s507_s17, %s507_s17 }
  0x40   :  { %602 = vmatprep.subr.bf16.mxu0 %v812_v0  ;;  %584 = vmatprep.subr.bf16.mxu1 %v812_v0  ;;  %v661_v11 = vld [vmem:[#allocation8 + $0x38] sm:$0xff]   ;;  %v662_v12 = vld [vmem:[#allocation8 + $0x30] sm:$0xff]   ;;  %v663_v13 = vld [vmem:[#allocation8 + $0x28] sm:$0xff]  }
  0x41   :  { %v664_v14 = vld [vmem:[#allocation8 + $0x20] sm:$0xff]   ;;  %v665_v15 = vld [vmem:[#allocation8 + $0x18] sm:$0xff]   ;;  %v666_v16 = vld [vmem:[#allocation8 + $0x10] sm:$0xff]  }
  0x42   :  { %579 = vmatmul.mubr.msk.bf16.vlgmr.msra.gmra.mxu0 %vm116_vm1, %v100_v2  ;;  %v517_v17 = vld [vmem:[%s942_s2] ss:$0 sm:$0xff]  ;;  %v667_v25 = vld [vmem:[#allocation8 + $0x8] sm:$0xff]   ;;  %v668_v26 = vld [vmem:[#allocation8] sm:$0xff]  }
  0x43   :  { %618 = vmatprep.mubr.msk.bf16.mxu0 %vm813_vm0, %v812_v0  ;;  %585 = vmatpush3.bf16.msra.mxu1 %v654_v4  ;;  %v669_v27 = vld [vmem:[#allocation10 + $0x38] sm:$0xff]   ;;  %v670_v28 = vld [vmem:[#allocation10 + $0x30] sm:$0xff]   ;;  %v671_v29 = vld [vmem:[#allocation10 + $0x28] sm:$0xff]  }
  0x44   :  { %586 = vmatprep.subr.bf16.mxu1 %v812_v0  ;;  %603 = vmatpush3.bf16.msra.mxu0 %v661_v11  ;;  %v672_v30 = vld [vmem:[#allocation10 + $0x20] sm:$0xff]   ;;  %v673_v31 = vld [vmem:[#allocation10 + $0x18] sm:$0xff]   ;;  %v674_v32 = vld [vmem:[#allocation10 + $0x10] sm:$0xff]  }
  0x45   :  { %604 = vmatprep.subr.bf16.mxu0 %v812_v0  ;;  %v520_v33 = vld [vmem:[%s944_s4] ss:$0 sm:$0xff]  ;;  %v675_v41 = vld [vmem:[#allocation10 + $0x8] sm:$0xff]   ;;  %v676_v42 = vld [vmem:[#allocation10] sm:$0xff]  }
  0x46   :  { %v529_v43 = vld [vmem:[%s946_s6] ss:$0 sm:$0xff]  ;;  %s777_s6 = scalar_lea.vmem %s507_s17, 128 }
  0x47   :  { %587 = vmatpush3.bf16.msra.mxu1 %v655_v5  ;;  %v538_v51 = vld [vmem:[%s948_s8] ss:$0 sm:$0xff]  ;;  %p778_p11 = scmp.ne.s32.totalorder %s507_s17, %s777_s6  ;;  %p783_p13 = scmp.lt.s32.totalorder %s777_s6, %s777_s6 }
  0x48   :  { %588 = vmatprep.subr.bf16.mxu1 %v812_v0  ;;  %605 = vmatpush3.bf16.msra.mxu0 %v662_v12 }
  0x49   :  { %606 = vmatprep.subr.bf16.mxu0 %v812_v0  ;;  %p784_p0 = por %p783_p13, %p782_p12 }
  0x4b   :  { %589 = vmatpush3.bf16.msra.mxu1 %v656_v6  ;;  %p785_p1 = pnand %p784_p0, %p778_p11 }
  0x4c   :  { %590 = vmatprep.subr.bf16.mxu1 %v812_v0  ;;  %607 = vmatpush3.bf16.msra.mxu0 %v663_v13 }
  0x4d   :  { %608 = vmatprep.subr.bf16.mxu0 %v812_v0 }
  0x4f   :  { %591 = vmatpush3.bf16.msra.mxu1 %v657_v7 }
  0x50   :  { %592 = vmatprep.subr.bf16.mxu1 %v812_v0  ;;  %609 = vmatpush3.bf16.msra.mxu0 %v664_v14 }
  0x51   :  { %610 = vmatprep.subr.bf16.mxu0 %v812_v0 }
  0x53   :  { %593 = vmatpush3.bf16.msra.mxu1 %v658_v8 }
  0x54   :  { %594 = vmatprep.subr.bf16.mxu1 %v812_v0  ;;  %611 = vmatpush3.bf16.msra.mxu0 %v665_v15 }
  0x55   :  { %612 = vmatprep.subr.bf16.mxu0 %v812_v0 }
  0x57   :  { %595 = vmatpush3.bf16.msra.mxu1 %v659_v9 }
  0x58   :  { %596 = vmatprep.subr.bf16.mxu1 %v812_v0  ;;  %613 = vmatpush3.bf16.msra.mxu0 %v666_v16 }
  0x59   :  { %614 = vmatprep.subr.bf16.mxu0 %v812_v0 }
  0x5b   :  { %597 = vmatpush3.bf16.msra.mxu1 %v660_v10 }
  0x5c   :  { %622 = vmatprep.subr.bf16.mxu1 %v812_v0  ;;  %615 = vmatpush3.bf16.msra.mxu0 %v667_v25 }
  0x5d   :  { %616 = vmatprep.subr.bf16.mxu0 %v812_v0 }
  0x60   :  { %617 = vmatpush3.bf16.msra.mxu0 %v668_v26 }
 0x102   :  { %v154_v18 = vpop.f32.mrf.mxu0 }
 0x103   :  { %v155_v19 = vadd.f32 %v517_v17, %v154_v18 }
 0x104   :  { %v580_v20 = vpop.f32.mrf.mxu0 }
 0x105   :  { %v160_v21 = vmax.f32 %v155_v19, 0.0 }
 0x106   :  { %v157_v22 = vpop.f32.mrf.mxu0 }
 0x107   :  { %v161_v23 = vpack.c.bf16 %v160_v21, %v160_v21 }
 0x108   :  { %v581_v24 = vpop.f32.mrf.mxu0 }
 0x109   :  { %599 = vmatmul.mubr.bf16.vlgmr.msra.gmra.mxu1 %v161_v23 }
 0x10a   :  { %638 = vmatprep.mubr.msk.bf16.mxu1 %vm813_vm0, %v812_v0  ;;  %623 = vmatpush3.bf16.msra.mxu1 %v669_v27 }
 0x10b   :  { %624 = vmatprep.subr.bf16.mxu1 %v812_v0 }
 0x10e   :  { %625 = vmatpush3.bf16.msra.mxu1 %v670_v28 }
 0x10f   :  { %626 = vmatprep.subr.bf16.mxu1 %v812_v0 }
 0x112   :  { %627 = vmatpush3.bf16.msra.mxu1 %v671_v29 }
 0x113   :  { %628 = vmatprep.subr.bf16.mxu1 %v812_v0 }
 0x116   :  { %629 = vmatpush3.bf16.msra.mxu1 %v672_v30 }
 0x117   :  { %630 = vmatprep.subr.bf16.mxu1 %v812_v0 }
 0x11a   :  { %631 = vmatpush3.bf16.msra.mxu1 %v673_v31 }
 0x11b   :  { %632 = vmatprep.subr.bf16.mxu1 %v812_v0 }
 0x11e   :  { %633 = vmatpush3.bf16.msra.mxu1 %v674_v32 }
 0x11f   :  { %634 = vmatprep.subr.bf16.mxu1 %v812_v0 }
 0x122   :  { %635 = vmatpush3.bf16.msra.mxu1 %v675_v41 }
 0x123   :  { %636 = vmatprep.subr.bf16.mxu1 %v812_v0 }
 0x126   :  { %637 = vmatpush3.bf16.msra.mxu1 %v676_v42 }
 0x1c9   :  { %v267_v34 = vpop.f32.mrf.mxu1 }
 0x1ca   :  { %v268_v35 = vadd.f32 %v520_v33, %v267_v34 }
 0x1cb   :  { %v600_v36 = vpop.f32.mrf.mxu1 }
 0x1cc   :  { %v273_v37 = vmax.f32 %v268_v35, 0.0 }
 0x1cd   :  { %v270_v38 = vpop.f32.mrf.mxu1 }
 0x1ce   :  { %v274_v39 = vpack.c.bf16 %v273_v37, %v273_v37 }
 0x1cf   :  { %v601_v40 = vpop.f32.mrf.mxu1 }
 0x1d0   :  { %619 = vmatmul.mubr.bf16.vlgmr.msra.gmra.mxu0 %v274_v39 }
 0x290   :  { %v380_v44 = vpop.f32.mrf.mxu0 }
 0x291   :  { %v381_v45 = vadd.f32 %v529_v43, %v380_v44 }
 0x292   :  { %v620_v46 = vpop.f32.mrf.mxu0 }
 0x293   :  { %v386_v47 = vmax.f32 %v381_v45, 0.0 }
 0x294   :  { %v383_v48 = vpop.f32.mrf.mxu0 }
 0x295   :  { %v387_v49 = vpack.c.bf16 %v386_v47, %v386_v47 }
 0x296   :  { %v621_v50 = vpop.f32.mrf.mxu0 }
 0x297   :  { %639 = vmatmul.mubr.bf16.vlgmr.msra.gmra.mxu1 %v387_v49 }
 0x357   :  { %v493_v52 = vpop.f32.mrf.mxu1 }
 0x358   :  { %v494_v53 = vadd.f32 %v538_v51, %v493_v52 }
 0x359   :  { %v640_v54 = vpop.f32.mrf.mxu1 }
 0x35a   :  { %499 = vst [vmem:[#allocation11] sm:$0xff] %v494_v53 }
 0x35b   :  { %v496_v55 = vpop.f32.mrf.mxu1 }
 0x35c   :  { %788 = shalt.err (!%p785_p1)
}
 0x35d   :  { %509 = dma.vmem_to_hbm [thread:$0]  %s507_s17, 128, %s949_s9, [#allocation4]   ;;  %v641_v56 = vpop.f32.mrf.mxu1 }
 0x35e   :  { %803 = dma.done.wait [#allocation4], 128  }
 0x35f   :  { %804 = vsyncadd [#allocation4], 4294967168 }
 0x360   :  { %513 = vsyncpa [#allocation3], 1 }
 0x361   :  { %514 = vsyncpa [#allocation6], 1 }
 0x362   :  { %515 = vsyncpa [#allocation9], 1 }
 0x363   :  { %516 = vsyncpa [#allocation4], 1 }

// kernel: tpu_custom_call.1
= control target key start
LH: loop header
LB: loop body
LE: loop exit
PB: predicated region body
PF: predicated region fallthrough
CT: control target
= control target key end

     0   :  { %14 = vsyncpa [#allocation3], 0  ;;  %s940_s0 = inlined_call_operand.hbm [shape: bf16[8,16], index: 0, kind: input, shape index: {}]   ;;  %s941_s1 = inlined_call_operand.hbm [shape: bf16[16,128], index: 1, kind: input, shape index: {}]   ;;  %s942_s2 = inlined_call_operand.vmem [shape: f32[1,128], index: 2, kind: input, shape index: {}]   ;;  %s943_s3 = inlined_call_operand.hbm [shape: bf16[128,128], index: 3, kind: input, shape index: {}]   ;;  %s944_s4 = inlined_call_operand.vmem [shape: f32[1,128], index: 4, kind: input, shape index: {}]   ;;  %s945_s5 = inlined_call_operand.hbm [shape: bf16[128,128], index: 5, kind: input, shape index: {}]   ;;  %s946_s6 = inlined_call_operand.vmem [shape: f32[1,128], index: 6, kind: input, shape index: {}]   ;;  %s947_s7 = inlined_call_operand.hbm [shape: bf16[128,128], index: 7, kind: input, shape index: {}]   ;;  %s948_s8 = inlined_call_operand.vmem [shape: f32[1,128], index: 8, kind: input, shape index: {}]   ;;  %s949_s9 = inlined_call_operand.hbm [shape: f32[8,128], index: 9, kind: output, shape index: {}]  }
   0x1   :  { %15 = vsyncpa [#allocation6], 0 }
   0x2   :  { %16 = vsyncpa [#allocation9], 0 }
   0x3   :  { %17 = vsyncpa [#allocation4], 0  ;;  %s805_s30 = smov [#allocation5]  }
   0x4   :  { %s33_s10 = sshll.u32 %s805_s30, 4  ;;  %s34_s10 = int_to_ptr.vmem [resolvable:$true] %s33_s10 }
   0x5   :  { %s685_s11 = scalar_lea.vmem %s34_s10, 128  ;;  %p690_p1 = scmp.lt.s32.totalorder %s34_s10, %s34_s10 }
   0x6   :  { %p686_p0 = scmp.ne.s32.totalorder %s34_s10, %s685_s11  ;;  %p691_p2 = scmp.lt.s32.totalorder %s685_s11, %s685_s11 }
   0x8   :  { %p692_p3 = por %p691_p2, %p690_p1 }
   0xa   :  { %p693_p4 = pnand %p692_p3, %p686_p0 }
   0xc   :  { %696 = shalt.err (!%p693_p4)
}
   0xd   :  { %s806_s12 = smov 64   ;;  %s807_s13 = smov 4  }
   0xe   :  { %39 = dma.hbm_to_vmem [thread:$0]  %s941_s1, 128, %s34_s10, [#allocation6], %s806_s12, %s806_s12, %s807_s13  }
   0xf   :  { %s808_s16 = smov [#allocation8]   ;;  %s809_s18 = smov [#allocation2]  }
  0x10   :  { %s61_s17 = sshll.u32 %s808_s16, 4  ;;  %s24_s19 = sshll.u32 %s809_s18, 4  ;;  %s62_s17 = int_to_ptr.vmem [resolvable:$true] %s61_s17  ;;  %s25_s19 = int_to_ptr.vmem [resolvable:$true] %s24_s19 }
  0x11   :  { %s705_s20 = scalar_lea.vmem %s62_s17, 1024  ;;  %p710_p6 = scmp.lt.s32.totalorder %s62_s17, %s62_s17 }
  0x12   :  { %p706_p5 = scmp.ne.s32.totalorder %s62_s17, %s705_s20  ;;  %p711_p7 = scmp.lt.s32.totalorder %s705_s20, %s705_s20 }
  0x14   :  { %p712_p8 = por %p711_p7, %p710_p6 }
  0x16   :  { %p713_p9 = pnand %p712_p8, %p706_p5 }
  0x18   :  { %716 = shalt.err (!%p713_p9)
}
  0x19   :  { %67 = dma.hbm_to_vmem [thread:$0]  %s945_s5, 1024, %s62_s17, [#allocation9], %s806_s12, %s806_s12, %s807_s13  }
  0x1a   :  { %s725_s1 = scalar_lea.vmem %s25_s19, 64  ;;  %p730_p11 = scmp.lt.s32.totalorder %s25_s19, %s25_s19 }
  0x1b   :  { %p726_p10 = scmp.ne.s32.totalorder %s25_s19, %s725_s1  ;;  %p731_p12 = scmp.lt.s32.totalorder %s725_s1, %s725_s1 }
  0x1d   :  { %p732_p13 = por %p731_p12, %p730_p11 }
  0x1f   :  { %p733_p0 = pnand %p732_p13, %p726_p10 }
  0x21   :  { %736 = shalt.err (!%p733_p0)
}
  0x22   :  { %27 = dma.hbm_to_vmem [thread:$0]  %s940_s0, 64, %s25_s19, [#allocation3]  }
  0x23   :  { %s810_s25 = smov [#allocation7]   ;;  %s811_s27 = smov [#allocation10]  }
  0x24   :  { %s47_s26 = sshll.u32 %s810_s25, 4  ;;  %s75_s28 = sshll.u32 %s811_s27, 4  ;;  %s48_s26 = int_to_ptr.vmem [resolvable:$true] %s47_s26  ;;  %s76_s28 = int_to_ptr.vmem [resolvable:$true] %s75_s28 }
  0x25   :  { %s745_s29 = scalar_lea.vmem %s48_s26, 1024  ;;  %p750_p2 = scmp.lt.s32.totalorder %s48_s26, %s48_s26 }
  0x26   :  { %p746_p1 = scmp.ne.s32.totalorder %s48_s26, %s745_s29  ;;  %p751_p3 = scmp.lt.s32.totalorder %s745_s29, %s745_s29 }
  0x28   :  { %p752_p4 = por %p751_p3, %p750_p2 }
  0x2a   :  { %p753_p5 = pnand %p752_p4, %p746_p1 }
  0x2c   :  { %756 = shalt.err (!%p753_p5)
}
  0x2d   :  { %53 = dma.hbm_to_vmem [thread:$0]  %s943_s3, 1024, %s48_s26, [#allocation6], %s806_s12, %s806_s12, %s807_s13  }
  0x2e   :  { %s765_s0 = scalar_lea.vmem %s76_s28, 1024  ;;  %p770_p7 = scmp.lt.s32.totalorder %s76_s28, %s76_s28 }
  0x2f   :  { %p766_p6 = scmp.ne.s32.totalorder %s76_s28, %s765_s0  ;;  %p771_p8 = scmp.lt.s32.totalorder %s765_s0, %s765_s0 }
  0x31   :  { %p772_p9 = por %p771_p8, %p770_p7 }
  0x33   :  { %p773_p10 = pnand %p772_p9, %p766_p6 }
  0x35   :  { %776 = shalt.err (!%p773_p10)
}
  0x36   :  { %81 = dma.hbm_to_vmem [thread:$0]  %s947_s7, 1024, %s76_s28, [#allocation9], %s806_s12, %s806_s12, %s807_s13  }
  0x37   :  { %797 = dma.done.wait [#allocation3], 64  }
  0x38   :  { %798 = vsyncadd [#allocation3], 4294967232 }
  0x39   :  { %799 = dma.done.wait [#allocation6], 1152  }
  0x3a   :  { %800 = vsyncadd [#allocation6], 4294966144 }
  0x3b   :  { %801 = dma.done.wait [#allocation9], 2048  }
  0x3c   :  { %802 = vsyncadd [#allocation9], 4294965248  ;;  %v812_v0 = vmov 0.0   ;;  %vm813_vm0 = vmmov 0   ;;  %v652_v1 = vld [vmem:[#allocation5] sm:$0xff]   ;;  %vm116_vm1 = vcmask 130048  }
  0x3d   :  { %576 = vmatprep.subr.bf16.mxu0 %v812_v0  ;;  %578 = vmatprep.mubr.msk.bf16.mxu0 %vm813_vm0, %v812_v0  ;;  %v100_v2 = vld [vmem:[#allocation2] sm:$0xf]  ;;  %v653_v3 = vld [vmem:[#allocation7 + $0x38] sm:$0xff]   ;;  %v655_v5 = vld [vmem:[#allocation7 + $0x28] sm:$0xff]   ;;  %s814_s16 = smov [#allocation11]  }
  0x3e   :  { %582 = vmatprep.subr.bf16.mxu1 %v812_v0  ;;  %598 = vmatprep.mubr.msk.bf16.mxu1 %vm813_vm0, %v812_v0  ;;  %v654_v4 = vld [vmem:[#allocation7 + $0x30] sm:$0xff]   ;;  %v656_v6 = vld [vmem:[#allocation7 + $0x20] sm:$0xff]   ;;  %v657_v7 = vld [vmem:[#allocation7 + $0x18] sm:$0xff]   ;;  %s506_s17 = sshll.u32 %s814_s16, 4  ;;  %s507_s17 = int_to_ptr.vmem [resolvable:$true] %s506_s17 }
  0x3f   :  { %577 = vmatpush3.bf16.msra.mxu0 %v652_v1  ;;  %583 = vmatpush3.bf16.msra.mxu1 %v653_v3  ;;  %v658_v8 = vld [vmem:[#allocation7 + $0x10] sm:$0xff]   ;;  %v659_v9 = vld [vmem:[#allocation7 + $0x8] sm:$0xff]   ;;  %v660_v10 = vld [vmem:[#allocation7] sm:$0xff]   ;;  %p782_p12 = scmp.lt.s32.totalorder %s507_s17, %s507_s17 }
  0x40   :  { %602 = vmatprep.subr.bf16.mxu0 %v812_v0  ;;  %584 = vmatprep.subr.bf16.mxu1 %v812_v0  ;;  %v661_v11 = vld [vmem:[#allocation8 + $0x38] sm:$0xff]   ;;  %v662_v12 = vld [vmem:[#allocation8 + $0x30] sm:$0xff]   ;;  %v663_v13 = vld [vmem:[#allocation8 + $0x28] sm:$0xff]  }
  0x41   :  { %v664_v14 = vld [vmem:[#allocation8 + $0x20] sm:$0xff]   ;;  %v665_v15 = vld [vmem:[#allocation8 + $0x18] sm:$0xff]   ;;  %v666_v16 = vld [vmem:[#allocation8 + $0x10] sm:$0xff]  }
  0x42   :  { %579 = vmatmul.mubr.msk.bf16.vlgmr.msra.gmra.mxu0 %vm116_vm1, %v100_v2  ;;  %v517_v17 = vld [vmem:[%s942_s2] ss:$0 sm:$0xff]  ;;  %v667_v25 = vld [vmem:[#allocation8 + $0x8] sm:$0xff]   ;;  %v668_v26 = vld [vmem:[#allocation8] sm:$0xff]  }
  0x43   :  { %618 = vmatprep.mubr.msk.bf16.mxu0 %vm813_vm0, %v812_v0  ;;  %585 = vmatpush3.bf16.msra.mxu1 %v654_v4  ;;  %v669_v27 = vld [vmem:[#allocation10 + $0x38] sm:$0xff]   ;;  %v670_v28 = vld [vmem:[#allocation10 + $0x30] sm:$0xff]   ;;  %v671_v29 = vld [vmem:[#allocation10 + $0x28] sm:$0xff]  }
  0x44   :  { %586 = vmatprep.subr.bf16.mxu1 %v812_v0  ;;  %603 = vmatpush3.bf16.msra.mxu0 %v661_v11  ;;  %v672_v30 = vld [vmem:[#allocation10 + $0x20] sm:$0xff]   ;;  %v673_v31 = vld [vmem:[#allocation10 + $0x18] sm:$0xff]   ;;  %v674_v32 = vld [vmem:[#allocation10 + $0x10] sm:$0xff]  }
  0x45   :  { %604 = vmatprep.subr.bf16.mxu0 %v812_v0  ;;  %v520_v33 = vld [vmem:[%s944_s4] ss:$0 sm:$0xff]  ;;  %v675_v41 = vld [vmem:[#allocation10 + $0x8] sm:$0xff]   ;;  %v676_v42 = vld [vmem:[#allocation10] sm:$0xff]  }
  0x46   :  { %v529_v43 = vld [vmem:[%s946_s6] ss:$0 sm:$0xff]  ;;  %s777_s6 = scalar_lea.vmem %s507_s17, 128 }
  0x47   :  { %587 = vmatpush3.bf16.msra.mxu1 %v655_v5  ;;  %v538_v51 = vld [vmem:[%s948_s8] ss:$0 sm:$0xff]  ;;  %p778_p11 = scmp.ne.s32.totalorder %s507_s17, %s777_s6  ;;  %p783_p13 = scmp.lt.s32.totalorder %s777_s6, %s777_s6 }
  0x48   :  { %588 = vmatprep.subr.bf16.mxu1 %v812_v0  ;;  %605 = vmatpush3.bf16.msra.mxu0 %v662_v12 }
  0x49   :  { %606 = vmatprep.subr.bf16.mxu0 %v812_v0  ;;  %p784_p0 = por %p783_p13, %p782_p12 }
  0x4b   :  { %589 = vmatpush3.bf16.msra.mxu1 %v656_v6  ;;  %p785_p1 = pnand %p784_p0, %p778_p11 }
  0x4c   :  { %590 = vmatprep.subr.bf16.mxu1 %v812_v0  ;;  %607 = vmatpush3.bf16.msra.mxu0 %v663_v13 }
  0x4d   :  { %608 = vmatprep.subr.bf16.mxu0 %v812_v0 }
  0x4f   :  { %591 = vmatpush3.bf16.msra.mxu1 %v657_v7 }
  0x50   :  { %592 = vmatprep.subr.bf16.mxu1 %v812_v0  ;;  %609 = vmatpush3.bf16.msra.mxu0 %v664_v14 }
  0x51   :  { %610 = vmatprep.subr.bf16.mxu0 %v812_v0 }
  0x53   :  { %593 = vmatpush3.bf16.msra.mxu1 %v658_v8 }
  0x54   :  { %594 = vmatprep.subr.bf16.mxu1 %v812_v0  ;;  %611 = vmatpush3.bf16.msra.mxu0 %v665_v15 }
  0x55   :  { %612 = vmatprep.subr.bf16.mxu0 %v812_v0 }
  0x57   :  { %595 = vmatpush3.bf16.msra.mxu1 %v659_v9 }
  0x58   :  { %596 = vmatprep.subr.bf16.mxu1 %v812_v0  ;;  %613 = vmatpush3.bf16.msra.mxu0 %v666_v16 }
  0x59   :  { %614 = vmatprep.subr.bf16.mxu0 %v812_v0 }
  0x5b   :  { %597 = vmatpush3.bf16.msra.mxu1 %v660_v10 }
  0x5c   :  { %622 = vmatprep.subr.bf16.mxu1 %v812_v0  ;;  %615 = vmatpush3.bf16.msra.mxu0 %v667_v25 }
  0x5d   :  { %616 = vmatprep.subr.bf16.mxu0 %v812_v0 }
  0x60   :  { %617 = vmatpush3.bf16.msra.mxu0 %v668_v26 }
 0x102   :  { %v154_v18 = vpop.f32.mrf.mxu0 }
 0x103   :  { %v155_v19 = vadd.f32 %v517_v17, %v154_v18 }
 0x104   :  { %v580_v20 = vpop.f32.mrf.mxu0 }
 0x105   :  { %v160_v21 = vmax.f32 %v155_v19, 0.0 }
 0x106   :  { %v157_v22 = vpop.f32.mrf.mxu0 }
 0x107   :  { %v161_v23 = vpack.c.bf16 %v160_v21, %v160_v21 }
 0x108   :  { %v581_v24 = vpop.f32.mrf.mxu0 }
 0x109   :  { %599 = vmatmul.mubr.bf16.vlgmr.msra.gmra.mxu1 %v161_v23 }
 0x10a   :  { %638 = vmatprep.mubr.msk.bf16.mxu1 %vm813_vm0, %v812_v0  ;;  %623 = vmatpush3.bf16.msra.mxu1 %v669_v27 }
 0x10b   :  { %624 = vmatprep.subr.bf16.mxu1 %v812_v0 }
 0x10e   :  { %625 = vmatpush3.bf16.msra.mxu1 %v670_v28 }
 0x10f   :  { %626 = vmatprep.subr.bf16.mxu1 %v812_v0 }
 0x112   :  { %627 = vmatpush3.bf16.msra.mxu1 %v671_v29 }
 0x113   :  { %628 = vmatprep.subr.bf16.mxu1 %v812_v0 }
 0x116   :  { %629 = vmatpush3.bf16.msra.mxu1 %v672_v30 }
 0x117   :  { %630 = vmatprep.subr.bf16.mxu1 %v812_v0 }
 0x11a   :  { %631 = vmatpush3.bf16.msra.mxu1 %v673_v31 }
 0x11b   :  { %632 = vmatprep.subr.bf16.mxu1 %v812_v0 }
 0x11e   :  { %633 = vmatpush3.bf16.msra.mxu1 %v674_v32 }
 0x11f   :  { %634 = vmatprep.subr.bf16.mxu1 %v812_v0 }
 0x122   :  { %635 = vmatpush3.bf16.msra.mxu1 %v675_v41 }
 0x123   :  { %636 = vmatprep.subr.bf16.mxu1 %v812_v0 }
 0x126   :  { %637 = vmatpush3.bf16.msra.mxu1 %v676_v42 }
 0x1c9   :  { %v267_v34 = vpop.f32.mrf.mxu1 }
 0x1ca   :  { %v268_v35 = vadd.f32 %v520_v33, %v267_v34 }
 0x1cb   :  { %v600_v36 = vpop.f32.mrf.mxu1 }
 0x1cc   :  { %v273_v37 = vmax.f32 %v268_v35, 0.0 }
 0x1cd   :  { %v270_v38 = vpop.f32.mrf.mxu1 }
 0x1ce   :  { %v274_v39 = vpack.c.bf16 %v273_v37, %v273_v37 }
 0x1cf   :  { %v601_v40 = vpop.f32.mrf.mxu1 }
 0x1d0   :  { %619 = vmatmul.mubr.bf16.vlgmr.msra.gmra.mxu0 %v274_v39 }
 0x290   :  { %v380_v44 = vpop.f32.mrf.mxu0 }
 0x291   :  { %v381_v45 = vadd.f32 %v529_v43, %v380_v44 }
 0x292   :  { %v620_v46 = vpop.f32.mrf.mxu0 }
 0x293   :  { %v386_v47 = vmax.f32 %v381_v45, 0.0 }
 0x294   :  { %v383_v48 = vpop.f32.mrf.mxu0 }
 0x295   :  { %v387_v49 = vpack.c.bf16 %v386_v47, %v386_v47 }
 0x296   :  { %v621_v50 = vpop.f32.mrf.mxu0 }
 0x297   :  { %639 = vmatmul.mubr.bf16.vlgmr.msra.gmra.mxu1 %v387_v49 }
 0x357   :  { %v493_v52 = vpop.f32.mrf.mxu1 }
 0x358   :  { %v494_v53 = vadd.f32 %v538_v51, %v493_v52 }
 0x359   :  { %v640_v54 = vpop.f32.mrf.mxu1 }
 0x35a   :  { %499 = vst [vmem:[#allocation11] sm:$0xff] %v494_v53 }
 0x35b   :  { %v496_v55 = vpop.f32.mrf.mxu1 }
 0x35c   :  { %788 = shalt.err (!%p785_p1)
}
 0x35d   :  { %509 = dma.vmem_to_hbm [thread:$0]  %s507_s17, 128, %s949_s9, [#allocation4]   ;;  %v641_v56 = vpop.f32.mrf.mxu1 }
 0x35e   :  { %803 = dma.done.wait [#allocation4], 128  }
 0x35f   :  { %804 = vsyncadd [#allocation4], 4294967168 }
 0x360   :  { %513 = vsyncpa [#allocation3], 1 }
 0x361   :  { %514 = vsyncpa [#allocation6], 1 }
 0x362   :  { %515 = vsyncpa [#allocation9], 1 }
 0x363   :  { %516 = vsyncpa [#allocation4], 1 }

</bundles_post_ra>
